<compile_context>
chip_gen: v5e
topology: v5e:2x2
jax: 0.10.0
libtpu: 0.0.40
codegen_flags: <defaults>
</compile_context>

<pallas_src>
import jax
import jax.numpy as jnp
from jax.experimental import pallas as pl
from jax.experimental.pallas import tpu as pltpu

_LANE = 128


def _round_up(v, m):
    return ((v + m - 1) // m) * m


def _make_mlp_kernel(use_bf16_mxu):
    mxu_dtype = jnp.bfloat16 if use_bf16_mxu else jnp.float32

    def kernel(xT_ref, w1T_ref, b1T_ref, w2T_ref, b2T_ref, w3T_ref, b3_ref, oT_ref):
        """All activations are [features, batch_tile] (batch on the 128-lane axis)."""
        xT = xT_ref[...].astype(mxu_dtype)                       # [IN, TB]

        # --- Linear(IN -> H) + ReLU on the MXU. K=IN=4 is tiny, but the MXU slots are
        #     otherwise idle and this keeps the VALU (the former bottleneck) nearly empty.
        h1 = jnp.dot(w1T_ref[...].astype(mxu_dtype), xT,
                     preferred_element_type=jnp.float32)
        h1 = jnp.maximum(h1 + b1T_ref[...], 0.0)                 # [H, TB]

        # Dropout(p=0.03): identity in eval mode.
        # TODO(synk): training-mode dropout (pltpu.prng_seed + pltpu.stateful_bernoulli).

        # --- Linear(H -> H) + ReLU on the MXU: [H, H] @ [H, TB].
        h2 = jnp.dot(w2T_ref[...].astype(mxu_dtype), h1.astype(mxu_dtype),
                     preferred_element_type=jnp.float32)
        h2 = jnp.maximum(h2 + b2T_ref[...], 0.0)                 # [H, TB]

        # --- Linear(H -> 1): [1, H] @ [H, TB] -> lane-dense [1, TB] output row.
        y = jnp.dot(w3T_ref[...].astype(mxu_dtype), h2.astype(mxu_dtype),
                    preferred_element_type=jnp.float32) + b3_ref[0, 0]

        oT_ref[...] = y.astype(oT_ref.dtype)

    return kernel


def stress_regressor_forward_fm(xT, params, *, batch_tile=32768, use_bf16_mxu=False):
    """Features-major entry point: xT is [input_dim, B] f32 (batch on lanes) -> [B] f32."""
    w1, b1, w2, b2, w3, b3 = params          # torch-style layouts: w [in, out], b [1, out]
    in_dim, B = xT.shape
    hidden = w1.shape[1]

    # Tiny (KiB-scale) weight re-layouts; negligible HBM traffic.
    w1T = jnp.transpose(w1)                  # [H, IN]
    b1T = jnp.transpose(b1)                  # [H, 1]
    w2T = jnp.transpose(w2)                  # [H, H]
    b2T = jnp.transpose(b2)                  # [H, 1]
    w3T = jnp.transpose(w3)                  # [1, H]
    b3s = jnp.reshape(b3, (1, 1))            # scalar -> SMEM

    # ---- lane-tile selection -------------------------------------------------------------
    b_lanes = max(_LANE, _round_up(B, _LANE))
    tb = min(_round_up(max(batch_tile, _LANE), _LANE), b_lanes, 65536)
    # v7x megacore: ensure >= 2 grid steps whenever the batch spans >= 2 lane tiles so the
    # "parallel" batch axis can be sharded across both TensorCores.
    if tb >= b_lanes and b_lanes >= 2 * _LANE:
        tb = _round_up(b_lanes // 2, _LANE)
    n_tiles = pl.cdiv(B, tb)
    out_lanes = n_tiles * tb                 # tile-aligned output allocation: every output
                                             # block store is full/unmasked; [:B] drops tail.

    # Rough per-step VMEM: double-buffered x/out blocks (8-sublane padded) + [H, tb] f32
    # temporaries.  Raise the scoped limit above it (v5e default is only 16 MiB).
    vmem_est = (2 * 2 * 8 * tb + 3 * hidden * tb) * 4 + (1 << 20)
    vmem_limit = min(max(int(1.5 * vmem_est), 32 << 20), 100 << 20)

    flops = 2 * out_lanes * (in_dim * hidden + hidden * hidden + hidden)
    bytes_accessed = (in_dim * B + out_lanes) * 4 + sum(int(p.size) for p in params) * 4

    out = pl.pallas_call(
        _make_mlp_kernel(use_bf16_mxu),
        out_shape=jax.ShapeDtypeStruct((1, out_lanes), jnp.float32),
        grid=(n_tiles,),
        in_specs=[
            pl.BlockSpec((in_dim, tb), lambda i: (0, i)),        # x: streamed/pipelined; the
                                                                 # last block may be partial
                                                                 # (garbage lanes discarded).
            pl.BlockSpec((hidden, in_dim), lambda i: (0, 0)),    # weights: VMEM-resident
            pl.BlockSpec((hidden, 1), lambda i: (0, 0)),
            pl.BlockSpec((hidden, hidden), lambda i: (0, 0)),
            pl.BlockSpec((hidden, 1), lambda i: (0, 0)),
            pl.BlockSpec((1, hidden), lambda i: (0, 0)),
            pl.BlockSpec(memory_space=pltpu.MemorySpace.SMEM),   # b3 scalar
        ],
        out_specs=pl.BlockSpec((1, tb), lambda i: (0, i)),       # lane-dense unmasked stores
        compiler_params=pltpu.CompilerParams(
            dimension_semantics=("parallel",),                   # megacore sharding (v7x)
            vmem_limit_bytes=vmem_limit,
        ),
        cost_estimate=pl.CostEstimate(
            flops=flops, transcendentals=0, bytes_accessed=bytes_accessed),
    )(xT, w1T, b1T, w2T, b2T, w3T, b3s)

    return out[0, :B]


def stress_regressor_forward(x, params, *, batch_tile=32768, use_bf16_mxu=False):
    """x: [B, input_dim] float32 -> [B] float32 (the PyTorch .squeeze(-1)).

    Note: the transpose below is one extra HBM pass over x; callers that can produce the
    features-major [input_dim, B] layout upstream should call stress_regressor_forward_fm.
    """
    return stress_regressor_forward_fm(jnp.transpose(x), params,
                                       batch_tile=batch_tile, use_bf16_mxu=use_bf16_mxu)


def init_params(key, input_dim=4, hidden_dim=32):
    """Deterministic init mimicking nn.Linear (uniform(-1/sqrt(fan_in), 1/sqrt(fan_in)))."""
    ks = jax.random.split(key, 6)

    def linear(kw, kb, fan_in, fan_out):
        bound = 1.0 / jnp.sqrt(jnp.float32(fan_in))
        w = jax.random.uniform(kw, (fan_in, fan_out), jnp.float32, -bound, bound)
        b = jax.random.uniform(kb, (1, fan_out), jnp.float32, -bound, bound)
        return w, b

    w1, b1 = linear(ks[0], ks[1], input_dim, hidden_dim)
    w2, b2 = linear(ks[2], ks[3], hidden_dim, hidden_dim)
    w3, b3 = linear(ks[4], ks[5], hidden_dim, 1)
    return (w1, b1, w2, b2, w3, b3)


def _reference_forward(x, params):
    w1, b1, w2, b2, w3, b3 = params
    h1 = jnp.maximum(x @ w1 + b1, 0.0)
    h2 = jnp.maximum(h1 @ w2 + b2, 0.0)
    return (h2 @ w3 + b3)[:, 0]


if __name__ == "__main__":
    key = jax.random.PRNGKey(0)
    k_x, k_p, k_x2 = jax.random.split(key, 3)

    B, INPUT_DIM, HIDDEN_DIM = 8, 4, 32
    x = jax.random.normal(k_x, (B, INPUT_DIM), jnp.float32)
    params = init_params(k_p, INPUT_DIM, HIDDEN_DIM)

    out = jax.block_until_ready(stress_regressor_forward(x, params))
    ref = _reference_forward(x, params)
    assert out.shape == (B,), out.shape
    assert jnp.allclose(out, ref, atol=1e-5, rtol=1e-5), (out, ref)

    # Multi-tile grid with a partial final x block (300 = 2*128 + 44), small tile.
    B2 = 300
    x2 = jax.random.normal(k_x2, (B2, INPUT_DIM), jnp.float32)
    out2 = jax.block_until_ready(stress_regressor_forward(x2, params, batch_tile=128))
    ref2 = _reference_forward(x2, params)
    assert out2.shape == (B2,), out2.shape
    assert jnp.allclose(out2, ref2, atol=1e-5, rtol=1e-5)

    # Default (large-tile) path, exercising the >=2-step megacore split heuristic.
    out3 = jax.block_until_ready(stress_regressor_forward(x2, params))
    assert jnp.allclose(out3, ref2, atol=1e-5, rtol=1e-5)

    print("KERNEL_OK")
</pallas_src>

<mosaic_0001>
module attributes {stable_mosaic.version = 11 : i64} {
  func.func @kernel(%arg0: i32, %arg1: memref<4x128xf32, #tpu.memory_space<vmem>>, %arg2: memref<32x4xf32, #tpu.memory_space<vmem>>, %arg3: memref<32x1xf32, #tpu.memory_space<vmem>>, %arg4: memref<32x32xf32, #tpu.memory_space<vmem>>, %arg5: memref<32x1xf32, #tpu.memory_space<vmem>>, %arg6: memref<1x32xf32, #tpu.memory_space<vmem>>, %arg7: memref<1x1xf32, #tpu.memory_space<smem>>, %arg8: memref<1x128xf32, #tpu.memory_space<vmem>>) attributes {dimension_semantics = [#tpu.dimension_semantics<parallel>], iteration_bounds = array<i64: 1>, scalar_prefetch = 0 : i64, scratch_operands = 0 : i64, tpu.core_type = #tpu.core_type<tc>, window_params = [{transform_indices = @transform_0, window_bounds = array<i64: 4, 128>}, {pipeline_mode = #tpu.pipeline_mode<synchronous>, transform_indices = @transform_1, window_bounds = array<i64: 32, 4>}, {pipeline_mode = #tpu.pipeline_mode<synchronous>, transform_indices = @transform_2, window_bounds = array<i64: 32, 1>}, {pipeline_mode = #tpu.pipeline_mode<synchronous>, transform_indices = @transform_3, window_bounds = array<i64: 32, 32>}, {pipeline_mode = #tpu.pipeline_mode<synchronous>, transform_indices = @transform_4, window_bounds = array<i64: 32, 1>}, {pipeline_mode = #tpu.pipeline_mode<synchronous>, transform_indices = @transform_5, window_bounds = array<i64: 1, 32>}, {transform_indices = @transform_6, window_bounds = array<i64: 1, 1>}, {transform_indices = @transform_7, window_bounds = array<i64: 1, 128>}]} {
    %c0 = arith.constant 0 : index
    %c0_0 = arith.constant 0 : index
    %0 = vector.load %arg1[%c0, %c0_0] : memref<4x128xf32, #tpu.memory_space<vmem>>, vector<4x128xf32>
    %c0_1 = arith.constant 0 : index
    %c0_2 = arith.constant 0 : index
    %1 = vector.load %arg2[%c0_1, %c0_2] : memref<32x4xf32, #tpu.memory_space<vmem>>, vector<32x4xf32>
    %cst = arith.constant dense<0.000000e+00> : vector<32x128xf32>
    %2 = tpu.matmul %1, %0, %cst {dimension_numbers = #tpu.dot_dimension_numbers<[1], [0], [0], [1], [0, 0, 1, 1], [], []>} : vector<32x4xf32>, vector<4x128xf32>, vector<32x128xf32> -> vector<32x128xf32>
    %c0_3 = arith.constant 0 : index
    %c0_4 = arith.constant 0 : index
    %3 = vector.load %arg3[%c0_3, %c0_4] : memref<32x1xf32, #tpu.memory_space<vmem>>, vector<32x1xf32>
    %4 = vector.broadcast %3 : vector<32x1xf32> to vector<32x128xf32>
    %5 = arith.addf %2, %4 : vector<32x128xf32>
    %cst_5 = arith.constant 0.000000e+00 : f32
    %6 = vector.broadcast %cst_5 : f32 to vector<32x128xf32>
    %7 = arith.maximumf %5, %6 : vector<32x128xf32>
    %c0_6 = arith.constant 0 : index
    %c0_7 = arith.constant 0 : index
    %8 = vector.load %arg4[%c0_6, %c0_7] : memref<32x32xf32, #tpu.memory_space<vmem>>, vector<32x32xf32>
    %cst_8 = arith.constant dense<0.000000e+00> : vector<32x128xf32>
    %9 = tpu.matmul %8, %7, %cst_8 {dimension_numbers = #tpu.dot_dimension_numbers<[1], [0], [0], [1], [0, 0, 1, 1], [], []>} : vector<32x32xf32>, vector<32x128xf32>, vector<32x128xf32> -> vector<32x128xf32>
    %c0_9 = arith.constant 0 : index
    %c0_10 = arith.constant 0 : index
    %10 = vector.load %arg5[%c0_9, %c0_10] : memref<32x1xf32, #tpu.memory_space<vmem>>, vector<32x1xf32>
    %11 = vector.broadcast %10 : vector<32x1xf32> to vector<32x128xf32>
    %12 = arith.addf %9, %11 : vector<32x128xf32>
    %cst_11 = arith.constant 0.000000e+00 : f32
    %13 = vector.broadcast %cst_11 : f32 to vector<32x128xf32>
    %14 = arith.maximumf %12, %13 : vector<32x128xf32>
    %c0_12 = arith.constant 0 : index
    %c0_13 = arith.constant 0 : index
    %15 = vector.load %arg6[%c0_12, %c0_13] : memref<1x32xf32, #tpu.memory_space<vmem>>, vector<1x32xf32>
    %cst_14 = arith.constant dense<0.000000e+00> : vector<1x128xf32>
    %16 = tpu.matmul %15, %14, %cst_14 {dimension_numbers = #tpu.dot_dimension_numbers<[1], [0], [0], [1], [0, 0, 1, 1], [], []>} : vector<1x32xf32>, vector<32x128xf32>, vector<1x128xf32> -> vector<1x128xf32>
    %c0_15 = arith.constant 0 : index
    %c0_16 = arith.constant 0 : index
    %17 = memref.load %arg7[%c0_15, %c0_16] : memref<1x1xf32, #tpu.memory_space<smem>>
    %18 = vector.broadcast %17 : f32 to vector<1x128xf32>
    %19 = arith.addf %16, %18 : vector<1x128xf32>
    %c0_17 = arith.constant 0 : index
    %c0_18 = arith.constant 0 : index
    %20 = vector.load %arg8[%c0_17, %c0_18] : memref<1x128xf32, #tpu.memory_space<vmem>>, vector<1x128xf32>
    tpu.vector_store %arg8[%c0_17, %c0_18], %19 {strides = array<i32>} : memref<1x128xf32, #tpu.memory_space<vmem>>, vector<1x128xf32>,
    return
  }
  func.func @transform_0(%arg0: i32) -> (i32, i32) {
    %c0_i32 = arith.constant 0 : i32
    %c0_i32_0 = arith.constant 0 : i32
    return %c0_i32, %arg0 : i32, i32
  }
  func.func @transform_1(%arg0: i32) -> (i32, i32) {
    %c0_i32 = arith.constant 0 : i32
    %c0_i32_0 = arith.constant 0 : i32
    %c0_i32_1 = arith.constant 0 : i32
    return %c0_i32, %c0_i32_0 : i32, i32
  }
  func.func @transform_2(%arg0: i32) -> (i32, i32) {
    %c0_i32 = arith.constant 0 : i32
    %c0_i32_0 = arith.constant 0 : i32
    %c0_i32_1 = arith.constant 0 : i32
    return %c0_i32, %c0_i32_0 : i32, i32
  }
  func.func @transform_3(%arg0: i32) -> (i32, i32) {
    %c0_i32 = arith.constant 0 : i32
    %c0_i32_0 = arith.constant 0 : i32
    %c0_i32_1 = arith.constant 0 : i32
    return %c0_i32, %c0_i32_0 : i32, i32
  }
  func.func @transform_4(%arg0: i32) -> (i32, i32) {
    %c0_i32 = arith.constant 0 : i32
    %c0_i32_0 = arith.constant 0 : i32
    %c0_i32_1 = arith.constant 0 : i32
    return %c0_i32, %c0_i32_0 : i32, i32
  }
  func.func @transform_5(%arg0: i32) -> (i32, i32) {
    %c0_i32 = arith.constant 0 : i32
    %c0_i32_0 = arith.constant 0 : i32
    %c0_i32_1 = arith.constant 0 : i32
    return %c0_i32, %c0_i32_0 : i32, i32
  }
  func.func @transform_6(%arg0: i32) -> (i32, i32) {
    %c0_i32 = arith.constant 0 : i32
    %c0_i32_0 = arith.constant 0 : i32
    %c0_i32_1 = arith.constant 0 : i32
    return %c0_i32, %c0_i32_0 : i32, i32
  }
  func.func @transform_7(%arg0: i32) -> (i32, i32) {
    %c0_i32 = arith.constant 0 : i32
    %c0_i32_0 = arith.constant 0 : i32
    return %c0_i32, %arg0 : i32, i32
  }
}

</mosaic_0001>

<bundles_post_ra>
// kernel: tpu_custom_call.1
= control target key start
LH: loop header
LB: loop body
LE: loop exit
PB: predicated region body
PF: predicated region fallthrough
CT: control target
= control target key end

     0   :  { %vm70_vm0 = vcmask 1043456   ;;  %vm57_vm1 = vcmask 31744   ;;  %v270_v5 = vmov 0   ;;  %s381_s0 = inlined_call_operand.vmem [shape: f32[4,8], index: 0, kind: input, shape index: {}]   ;;  %s382_s1 = inlined_call_operand.vmem [shape: f32[32,4], index: 1, kind: input, shape index: {}]   ;;  %s383_s2 = inlined_call_operand.vmem [shape: f32[32,1], index: 2, kind: input, shape index: {}]   ;;  %s384_s3 = inlined_call_operand.vmem [shape: f32[32,32], index: 3, kind: input, shape index: {}]   ;;  %s385_s4 = inlined_call_operand.vmem [shape: f32[32,1], index: 4, kind: input, shape index: {}]   ;;  %s386_s5 = inlined_call_operand.vmem [shape: f32[1,32], index: 5, kind: input, shape index: {}]   ;;  %s387_s6 = inlined_call_operand.<no memory space> [shape: f32[1,1], index: 6, kind: input, shape index: {}]   ;;  %s388_s7 = inlined_call_operand.hbm [shape: f32[1,128], index: 7, kind: output, shape index: {}]  }
   0x1   :  { %v28_v0 = vld [vmem:[%s381_s0] sm:$0xf]  ;;  %v32_v2 = vld [vmem:[%s382_s1 + $0x18] sm:$0xff]  ;;  %v34_v4 = vld [vmem:[%s383_s2 + $0x8] sm:$0xff]  ;;  %242 = vset.pattern.permute.xlu1 %v270_v5  ;;  %241 = vset.pattern.permute.xlu0 %v270_v5 }
   0x2   :  { %v29_v1 = vld [vmem:[%s382_s1] sm:$0xff]  ;;  %224 = vmatpush.msk.msra.mxu0 %vm70_vm0, %v28_v0  ;;  %234 = vmatpush.msk.msra.mxu2 %vm70_vm0, %v28_v0  ;;  %v36_v3 = vld [vmem:[%s383_s2 + $0x18] sm:$0xff] }
   0x3   :  { %225 = vmatmul.msk.f32.vlgmr.msra.gmra.mxu0 %vm57_vm1, %v29_v1  ;;  %228 = vmatmul.msk.f32.vlgmr.msra.gmra.mxu2 %vm57_vm1, %v32_v2 }
   0x4   :  { %54 = vperm.xlu0 %241, %v36_v3   ;;  %44 = vperm.xlu1 %242, %v34_v4  }
   0x5   :  { %13 = vsyncpa [#allocation4], 0  ;;  %243 = vset.pattern.permute.xlu2 %v270_v5  ;;  %v30_v6 = vld [vmem:[%s382_s1 + $0x8] sm:$0xff]  ;;  %v35_v7 = vld [vmem:[%s383_s2 + $0x10] sm:$0xff]  ;;  %vm135_vm2 = vcmask 261120   ;;  %v183_v51 = vstv %s387_s6  ;;  %s271_s0 = smov [#allocation3]  }
   0x6   :  { %v33_v8 = vld [vmem:[%s383_s2] sm:$0xff]  ;;  %v31_v9 = vld [vmem:[%s382_s1 + $0x10] sm:$0xff]  ;;  %v112_v10 = vld [vmem:[%s385_s4 + $0x8] sm:$0xff]  ;;  %s213_s11 = sshll.u32 %s271_s0, 4  ;;  %s215_s14 = sshll.u32 %s388_s7, 4  ;;  %s214_s11 = int_to_ptr.vmem [resolvable:$true] %s213_s11  ;;  %s216_s14 = int_to_ptr.hbm [resolvable:$true] %s215_s14 }
   0x7   :  { %v111_v11 = vld [vmem:[%s385_s4] sm:$0xff]  ;;  %v114_v13 = vld [vmem:[%s385_s4 + $0x18] sm:$0xff]  ;;  %v113_v19 = vld [vmem:[%s385_s4 + $0x10] sm:$0xff] }
   0x8   :  { %132 = vperm.xlu2 %243, %v114_v13   ;;  %v107_v30 = vld [vmem:[%s384_s3] sm:$0xff]  ;;  %v109_v31 = vld [vmem:[%s384_s3 + $0x10] sm:$0xff]  ;;  %v108_v32 = vld [vmem:[%s384_s3 + $0x8] sm:$0xff] }
   0x9   :  { %v110_v33 = vld [vmem:[%s384_s3 + $0x18] sm:$0xff]  ;;  %v181_v50 = vld [vmem:[%s386_s5] sm:$0x1] }
   0xb   :  { %226 = vmatmul.msk.f32.gmra.mxu0 %vm57_vm1, %v30_v6 }
   0xc   :  { %49 = vperm.xlu0 %241, %v35_v7   ;;  %39 = vperm.xlu1 %242, %v33_v8  }
  0x10   :  { %127 = vperm.xlu2 %243, %v113_v19  }
  0x13   :  { %227 = vmatmul.msk.f32.gmra.mxu0 %vm57_vm1, %v31_v9 }
  0x14   :  { %122 = vperm.xlu0 %241, %v112_v10   ;;  %117 = vperm.xlu1 %242, %v111_v11  }
  0x62   :  { %v133_v34 = vpop.permute.xlu2 %132 }
  0x6a   :  { %v128_v37 = vpop.permute.xlu2 %127 }
  0x76   :  { %v55_v14 = vpop.permute.xlu0 %54  ;;  %v45_v15 = vpop.permute.xlu1 %44 }
  0x7e   :  { %v50_v21 = vpop.permute.xlu0 %49  ;;  %v40_v22 = vpop.permute.xlu1 %39 }
  0x80   :  { %v91_v12 = vpop.f32.mrf.mxu0 }
  0x81   :  { %v92_v26 = vadd.f32 %v91_v12, %v40_v22 }
  0x83   :  { %v103_v29 = vmax.f32 %v92_v26, 0.0 }
  0x86   :  { %v100_v16 = vpop.f32.mrf.mxu2  ;;  %v123_v42 = vpop.permute.xlu0 %122 }
  0x87   :  { %v101_v18 = vadd.f32 %v100_v16, %v55_v14  ;;  %v118_v45 = vpop.permute.xlu1 %117 }
  0x88   :  { %v94_v17 = vpop.f32.mrf.mxu0 }
  0x89   :  { %v106_v20 = vmax.f32 %v101_v18, 0.0  ;;  %v95_v24 = vadd.f32 %v94_v17, %v45_v15 }
  0x8b   :  { %160 = vmatpush.msra.mxu1 %v106_v20  ;;  %235 = vmatpush.msra.mxu3 %v106_v20  ;;  %v104_v28 = vmax.f32 %v95_v24, 0.0 }
  0x90   :  { %v97_v23 = vpop.f32.mrf.mxu0 }
  0x91   :  { %v98_v25 = vadd.f32 %v97_v23, %v50_v21 }
  0x93   :  { %v105_v27 = vmax.f32 %v98_v25, 0.0 }
  0x95   :  { %161 = vmatpush.msra.mxu1 %v105_v27  ;;  %236 = vmatpush.msra.mxu3 %v105_v27 }
  0x97   :  { %162 = vmatpush.msra.mxu1 %v104_v28  ;;  %237 = vmatpush.msra.mxu3 %v104_v28 }
  0x99   :  { %163 = vmatpush.msra.mxu1 %v103_v29  ;;  %238 = vmatpush.msra.mxu3 %v103_v29 }
  0x9a   :  { %229 = vmatmul.msk.f32.vlgmr.msra.gmra.mxu1 %vm135_vm2, %v107_v30  ;;  %231 = vmatmul.msk.f32.vlgmr.msra.gmra.mxu3 %vm135_vm2, %v109_v31 }
  0xa2   :  { %230 = vmatmul.msk.f32.gmra.mxu1 %vm135_vm2, %v108_v32  ;;  %232 = vmatmul.msk.f32.gmra.mxu3 %vm135_vm2, %v110_v33 }
 0x117   :  { %v165_v35 = vpop.f32.mrf.mxu1 }
 0x118   :  { %v166_v46 = vadd.f32 %v165_v35, %v118_v45 }
 0x11a   :  { %v177_v49 = vmax.f32 %v166_v46, 0.0 }
 0x11d   :  { %v171_v36 = vpop.f32.mrf.mxu3 }
 0x11e   :  { %v172_v40 = vadd.f32 %v171_v36, %v128_v37 }
 0x11f   :  { %v168_v38 = vpop.f32.mrf.mxu1 }
 0x120   :  { %v169_v43 = vadd.f32 %v168_v38, %v123_v42  ;;  %v179_v47 = vmax.f32 %v172_v40, 0.0 }
 0x122   :  { %v178_v48 = vmax.f32 %v169_v43, 0.0 }
 0x125   :  { %v174_v39 = vpop.f32.mrf.mxu3 }
 0x126   :  { %v175_v41 = vadd.f32 %v174_v39, %v133_v34 }
 0x128   :  { %v180_v44 = vmax.f32 %v175_v41, 0.0 }
 0x12a   :  { %199 = vmatpush.msrb.mxu2 %v180_v44 }
 0x12c   :  { %200 = vmatpush.msrb.mxu2 %v179_v47 }
 0x12e   :  { %201 = vmatpush.msrb.mxu2 %v178_v48 }
 0x130   :  { %202 = vmatpush.msrb.mxu2 %v177_v49 }
 0x131   :  { %233 = vmatmul.msk.f32.vlgmr.msrb.gmra.mxu2 %vm135_vm2, %v181_v50 }
 0x1b4   :  { %v204_v52 = vpop.f32.mrf.mxu2 }
 0x1b5   :  { %v205_v53 = vadd.f32 %v204_v52, %v183_v51 }
 0x1b7   :  { %207 = vst [vmem:[#allocation3] sm:$0x1] %v205_v53 }
 0x1b8   :  { %218 = dma.vmem_to_hbm [thread:$0]  %s214_s11, 16, %s216_s14, [#allocation4]  }
 0x1b9   :  { %268 = dma.done.wait [#allocation4], 16  }
 0x1ba   :  { %269 = vsyncadd [#allocation4], 4294967280 }
 0x1bb   :  { %223 = vsyncpa [#allocation4], 1 }

</bundles_post_ra>
